<compile_context>
chip_gen: v7x
topology: tpu7x:2x2x1
jax: 0.10.0
libtpu: 0.0.40
codegen_flags: <defaults>
</compile_context>

<pallas_src>
import functools

import jax
import jax.numpy as jnp
from jax.experimental import pallas as pl
from jax.experimental.pallas import tpu as pltpu


def _lora_kernel(alpha_ref, x_ref, wa_ref, wb_ref, o_ref):
    """One batch tile: o = (alpha * (x @ W_a)) @ W_b, lane-dense output."""
    # MXU matmul #1: [tm, in_dim] @ [in_dim, rank] -> [tm, rank], f32 accum.
    xa = jnp.dot(x_ref[...], wa_ref[...], preferred_element_type=jnp.float32)
    # Scale the low-rank intermediate (tm*rank elements, not tm*out_dim).
    # alpha comes from SMEM -> no recompilation when alpha changes.
    xa = xa * alpha_ref[0]
    # MXU matmul #2: [tm, rank] @ [rank, out_p] -> [tm, out_p], f32 accum.
    y = jnp.dot(xa.astype(wb_ref.dtype), wb_ref[...],
                preferred_element_type=jnp.float32)
    o_ref[...] = y.astype(o_ref.dtype)


def lora_forward(x, w_a, w_b, alpha, *, tile_m=256, compute_dtype=None):
    """alpha * (x @ w_a @ w_b) via a single Pallas TPU kernel.

    x:   [batch, in_dim]
    w_a: [in_dim, rank]
    w_b: [rank, out_dim]
    compute_dtype: optionally cast operands (e.g. jnp.bfloat16 on v6e/v7x);
                   accumulation stays f32, output keeps x's original dtype.
    """
    assert tile_m % 8 == 0, "tile_m must be a multiple of 8 (sublanes)"
    batch, in_dim = x.shape
    in_dim2, rank = w_a.shape
    rank2, out_dim = w_b.shape
    assert in_dim == in_dim2 and rank == rank2

    out_dtype = x.dtype
    if compute_dtype is not None:
        x = x.astype(compute_dtype)
        w_a = w_a.astype(compute_dtype)
        w_b = w_b.astype(compute_dtype)

    # ---- lane-dense output: pad out_dim up to a multiple of 128 ----------
    out_p = max(128, pl.cdiv(out_dim, 128) * 128)
    if out_p != out_dim:
        w_b = jnp.pad(w_b, ((0, 0), (0, out_p - out_dim)))

    # ---- batch tiling ------------------------------------------------------
    if batch <= tile_m:
        tm = batch                      # full-extent block (always legal)
        batch_p = batch
    else:
        tm = tile_m                     # multiple of 8 -> sublane rule ok
        batch_p = pl.cdiv(batch, tm) * tm
        if batch_p != batch:
            x = jnp.pad(x, ((0, batch_p - batch), (0, 0)))
    grid = (batch_p // tm,)

    # TODO(synk): for very large in_dim (>~8k on v7x's 64 MiB VMEM) add a
    # K-reduction grid axis with a (tm, rank) f32 VMEM accumulator
    # (pl.when init on k==0, second matmul only on the last k step).

    alpha_arr = jnp.asarray([alpha], dtype=jnp.float32)

    itemsize = jnp.dtype(x.dtype).itemsize
    cost = pl.CostEstimate(
        flops=2 * batch_p * rank * (in_dim + out_p) + batch_p * rank,
        transcendentals=0,
        bytes_accessed=(batch_p * in_dim * itemsize
                        + in_dim * rank * itemsize
                        + rank * out_p * itemsize
                        + batch_p * out_p * jnp.dtype(out_dtype).itemsize),
    )

    y_p = pl.pallas_call(
        _lora_kernel,
        out_shape=jax.ShapeDtypeStruct((batch_p, out_p), out_dtype),
        grid=grid,
        in_specs=[
            # alpha scalar lives in SMEM (one sld, no recompile per value)
            pl.BlockSpec(memory_space=pltpu.MemorySpace.SMEM),
            # x: one batch tile per grid step (double-buffered by Pallas)
            pl.BlockSpec((tm, in_dim), lambda i: (i, 0)),
            # W_a / W_b: full-extent, VMEM-resident across all grid steps
            pl.BlockSpec((in_dim, rank), lambda i: (0, 0)),
            pl.BlockSpec((rank, out_p), lambda i: (0, 0)),
        ],
        out_specs=pl.BlockSpec((tm, out_p), lambda i: (i, 0)),
        compiler_params=pltpu.CompilerParams(
            dimension_semantics=("parallel",)),   # shard batch across TCs (v7x)
        cost_estimate=cost,
    )(alpha_arr, x, w_a, w_b)

    # Strip batch / lane padding.
    return y_p[:batch, :out_dim]


if __name__ == "__main__":
    # Module config (synthetic, deterministic init):
    in_dim, out_dim, rank, alpha = 32, 32, 4, 2.0
    batch = 8

    key = jax.random.PRNGKey(0)
    kx, ka, kb = jax.random.split(key, 3)

    x = jax.random.normal(kx, (batch, in_dim), dtype=jnp.float32)
    # W_a: randn(in_dim, rank) * 1/sqrt(rank)   (matches module __init__)
    w_a = jax.random.normal(ka, (in_dim, rank), dtype=jnp.float32) / jnp.sqrt(
        jnp.float32(rank))
    # Module inits W_b to zeros; use small random values here so the kernel
    # output is non-trivial (same shape / semantics as the module parameter).
    w_b = 0.01 * jax.random.normal(kb, (rank, out_dim), dtype=jnp.float32)

    y_ref = alpha * (x @ w_a @ w_b)

    # f32 path (matches module semantics exactly).
    y = lora_forward(x, w_a, w_b, alpha)
    jax.block_until_ready(y)
    assert y.shape == y_ref.shape
    assert jnp.allclose(y, y_ref, atol=1e-5, rtol=1e-5), "f32 mismatch vs reference"

    # bf16 operand path (v6e/v7x MXU peak); f32 accumulation, loose tolerance.
    y_bf16 = lora_forward(x, w_a, w_b, alpha, compute_dtype=jnp.bfloat16)
    jax.block_until_ready(y_bf16)
    assert jnp.allclose(y_bf16, y_ref, atol=5e-2, rtol=5e-2), "bf16 mismatch"

    # Tiled-batch path: grid > 1, batch not a multiple of the tile.
    big_batch = 300
    xb = jax.random.normal(kx, (big_batch, in_dim), dtype=jnp.float32)
    yb = lora_forward(xb, w_a, w_b, alpha, tile_m=128)
    jax.block_until_ready(yb)
    yb_ref = alpha * (xb @ w_a @ w_b)
    assert jnp.allclose(yb, yb_ref, atol=1e-5, rtol=1e-5), "tiled mismatch"

    print("KERNEL_OK")
</pallas_src>

<mosaic_0001>
module attributes {stable_mosaic.version = 11 : i64} {
  func.func @_lora_kernel(%arg0: i32, %arg1: memref<1xf32, #tpu.memory_space<smem>>, %arg2: memref<8x32xf32, #tpu.memory_space<vmem>>, %arg3: memref<32x4xf32, #tpu.memory_space<vmem>>, %arg4: memref<4x128xf32, #tpu.memory_space<vmem>>, %arg5: memref<8x128xf32, #tpu.memory_space<vmem>>) attributes {dimension_semantics = [#tpu.dimension_semantics<parallel>], iteration_bounds = array<i64: 1>, scalar_prefetch = 0 : i64, scratch_operands = 0 : i64, tpu.core_type = #tpu.core_type<tc>, window_params = [{transform_indices = @transform_0, window_bounds = array<i64: 1>}, {transform_indices = @transform_1, window_bounds = array<i64: 8, 32>}, {pipeline_mode = #tpu.pipeline_mode<synchronous>, transform_indices = @transform_2, window_bounds = array<i64: 32, 4>}, {pipeline_mode = #tpu.pipeline_mode<synchronous>, transform_indices = @transform_3, window_bounds = array<i64: 4, 128>}, {transform_indices = @transform_4, window_bounds = array<i64: 8, 128>}]} {
    %c0 = arith.constant 0 : index
    %c0_0 = arith.constant 0 : index
    %0 = vector.load %arg2[%c0, %c0_0] : memref<8x32xf32, #tpu.memory_space<vmem>>, vector<8x32xf32>
    %c0_1 = arith.constant 0 : index
    %c0_2 = arith.constant 0 : index
    %1 = vector.load %arg3[%c0_1, %c0_2] : memref<32x4xf32, #tpu.memory_space<vmem>>, vector<32x4xf32>
    %cst = arith.constant dense<0.000000e+00> : vector<8x4xf32>
    %2 = tpu.matmul %0, %1, %cst {dimension_numbers = #tpu.dot_dimension_numbers<[1], [0], [0], [1], [0, 0, 1, 1], [], []>} : vector<8x32xf32>, vector<32x4xf32>, vector<8x4xf32> -> vector<8x4xf32>
    %c0_3 = arith.constant 0 : index
    %3 = memref.load %arg1[%c0_3] : memref<1xf32, #tpu.memory_space<smem>>
    %4 = vector.broadcast %3 : f32 to vector<8x4xf32>
    %5 = arith.mulf %2, %4 : vector<8x4xf32>
    %c0_4 = arith.constant 0 : index
    %c0_5 = arith.constant 0 : index
    %6 = vector.load %arg4[%c0_4, %c0_5] : memref<4x128xf32, #tpu.memory_space<vmem>>, vector<4x128xf32>
    %cst_6 = arith.constant dense<0.000000e+00> : vector<8x128xf32>
    %7 = tpu.matmul %5, %6, %cst_6 {dimension_numbers = #tpu.dot_dimension_numbers<[1], [0], [0], [1], [0, 0, 1, 1], [], []>} : vector<8x4xf32>, vector<4x128xf32>, vector<8x128xf32> -> vector<8x128xf32>
    %c0_7 = arith.constant 0 : index
    %c0_8 = arith.constant 0 : index
    %8 = vector.load %arg5[%c0_7, %c0_8] : memref<8x128xf32, #tpu.memory_space<vmem>>, vector<8x128xf32>
    tpu.vector_store %arg5[%c0_7, %c0_8], %7 {strides = array<i32>} : memref<8x128xf32, #tpu.memory_space<vmem>>, vector<8x128xf32>,
    return
  }
  func.func @transform_0(%arg0: i32) -> i32 {
    %c0_i32 = arith.constant 0 : i32
    %c0_i32_0 = arith.constant 0 : i32
    return %c0_i32 : i32
  }
  func.func @transform_1(%arg0: i32) -> (i32, i32) {
    %c0_i32 = arith.constant 0 : i32
    %c0_i32_0 = arith.constant 0 : i32
    return %arg0, %c0_i32 : i32, i32
  }
  func.func @transform_2(%arg0: i32) -> (i32, i32) {
    %c0_i32 = arith.constant 0 : i32
    %c0_i32_0 = arith.constant 0 : i32
    %c0_i32_1 = arith.constant 0 : i32
    return %c0_i32, %c0_i32_0 : i32, i32
  }
  func.func @transform_3(%arg0: i32) -> (i32, i32) {
    %c0_i32 = arith.constant 0 : i32
    %c0_i32_0 = arith.constant 0 : i32
    %c0_i32_1 = arith.constant 0 : i32
    return %c0_i32, %c0_i32_0 : i32, i32
  }
  func.func @transform_4(%arg0: i32) -> (i32, i32) {
    %c0_i32 = arith.constant 0 : i32
    %c0_i32_0 = arith.constant 0 : i32
    return %arg0, %c0_i32 : i32, i32
  }
}

</mosaic_0001>

<bundles_post_ra>
// kernel: tpu_custom_call.1
= control target key start
LH: loop header
LB: loop body
LE: loop exit
PB: predicated region body
PF: predicated region fallthrough
CT: control target
= control target key end

     0   :  { %v255_v3 = vmov 0.0|0.0   ;;  %vm256_vm0 = vmmov 0   ;;  %v257_v6 = vmov 0.0   ;;  %s317_s0 = inlined_call_operand.<no memory space> [shape: f32[1], index: 0, kind: input, shape index: {}]   ;;  %s318_s1 = inlined_call_operand.vmem [shape: f32[8,32], index: 1, kind: input, shape index: {}]   ;;  %s319_s2 = inlined_call_operand.vmem [shape: f32[32,4], index: 2, kind: input, shape index: {}]   ;;  %s320_s3 = inlined_call_operand.vmem [shape: f32[4,128], index: 3, kind: input, shape index: {}]   ;;  %s321_s4 = inlined_call_operand.hbm [shape: f32[8,128], index: 4, kind: output, shape index: {}]  }
   0x1   :  { %v20_v0 = vld [vmem:[%s319_s2] sm:$0xff]  ;;  %v21_v1 = vld [vmem:[%s319_s2 + $0x8] sm:$0xff]  ;;  %v22_v2 = vld [vmem:[%s319_s2 + $0x10] sm:$0xff]  ;;  %221 = vmatprep.subr.bf16.mxu0 %v255_v3  ;;  %213 = vmatprep.mubr.msk.f32.mxu0 %vm256_vm0, %v257_v6 }
   0x2   :  { %v222_v4 = vpack.c.bf16 %v21_v1, %v20_v0  ;;  %v23_v5 = vld [vmem:[%s319_s2 + $0x18] sm:$0xff] }
   0x3   :  { %10 = vsyncpa [#allocation4], 0  ;;  %216 = vmatprep.subr.mxu1 %v257_v6  ;;  %218 = vmatprep.mubr.msk.f32.mxu1 %vm256_vm0, %v257_v6  ;;  %v225_v7 = vpack.c.bf16 %v23_v5, %v22_v2  ;;  %v19_v8 = vld [vmem:[%s318_s1] sm:$0xff]  ;;  %vm24_vm1 = vcmask 261120   ;;  %vm106_vm2 = vcmask 1043456   ;;  %v99_v10 = vstv %s317_s0  ;;  %s258_s28 = smov [#allocation3]  }
   0x4   :  { %223 = vmatpush3.bf16.msra.mxu0 %v222_v4  ;;  %v101_v9 = vld [vmem:[%s320_s3] sm:$0xf]  ;;  %vm102_vm3 = vcmask 31744   ;;  %s187_s29 = sshll.u32 %s258_s28, 4  ;;  %s188_s29 = int_to_ptr.vmem [resolvable:$true] %s187_s29 }
   0x5   :  { %224 = vmatprep.subr.bf16.mxu0 %v255_v3  ;;  %217 = vmatpush3.msk.msra.mxu1 %vm106_vm2, %v101_v9  ;;  %s231_s1 = scalar_lea.vmem %s188_s29, 128  ;;  %p236_p1 = scmp.lt.s32.totalorder %s188_s29, %s188_s29 }
   0x6   :  { %p232_p0 = scmp.ne.s32.totalorder %s188_s29, %s231_s1  ;;  %p237_p2 = scmp.lt.s32.totalorder %s231_s1, %s231_s1 }
   0x8   :  { %226 = vmatpush3.bf16.msra.mxu0 %v225_v7  ;;  %p238_p3 = por %p237_p2, %p236_p1 }
   0xa   :  { %p239_p4 = pnand %p238_p3, %p232_p0 }
   0xb   :  { %214 = vmatmul.mubr.msk.f32.vlgmr.msra.gmra.mrb[0].mxu0 %vm24_vm1, %v19_v8 }
  0xde   :  { %v94_v11 = vpop.f32.mrb[0].mxu0 }
  0xdf   :  { %v100_v12 = vmul.f32 %v99_v10, %v94_v11  ;;  %v215_v13 = vpop.f32.mrb[1].mxu0 }
  0xe1   :  { %219 = vmatmul.mubr.msk.f32.vlgmr.msra.gmra.mrb[0].mxu1 %vm102_vm3, %v100_v12 }
 0x1b4   :  { %v176_v14 = vpop.f32.mrb[0].mxu1 }
 0x1b5   :  { %180 = vst [vmem:[#allocation3] sm:$0xff] %v176_v14  ;;  %v220_v15 = vpop.f32.mrb[1].mxu1 }
 0x1b6   :  { %242 = shalt.err (!%p239_p4)
}
 0x1b7   :  { %s243_s30 = scalar_lea.hbm %s321_s4, 128 }
 0x1b8   :  { %p244_p5 = scmp.ne.s32.totalorder %s321_s4, %s243_s30  ;;  %p247_p6 = scmp.lt.u32.totalorder %s243_s30, %s321_s4 }
 0x1ba   :  { %p249_p7 = pnand %p247_p6, %p244_p5 }
 0x1bc   :  { %252 = shalt.err (!%p249_p7)
}
 0x1bd   :  { %190 = dma.vmem_to_hbm [thread:$0]  %s188_s29, 128, %s321_s4, [#allocation4]  }
 0x1be   :  { %253 = dma.done.wait [#allocation4], 128  }
 0x1bf   :  { %254 = vsyncadd [#allocation4], 4294967168 }
 0x1c0   :  { %194 = vsyncpa [#allocation4], 1 }

</bundles_post_ra>
